<compile_context>
chip_gen: v7x
topology: tpu7x:2x2x1
jax: 0.10.0
libtpu: 0.0.40
codegen_flags: <defaults>
</compile_context>

<pallas_src>
import jax
import jax.numpy as jnp
import numpy as np
from jax import lax
from jax.experimental import pallas as pl
from jax.experimental.pallas import tpu as pltpu


# ----------------------------- JAX glue ops ------------------------------ #

def compute_dist_square(src, tar):
    # src [B,N,C], tar [B,S,C] -> [B,N,S]
    d = -2.0 * jnp.einsum("bnc,bsc->bns", src, tar)
    d = d + jnp.sum(src ** 2, axis=-1)[:, :, None]
    d = d + jnp.sum(tar ** 2, axis=-1)[:, None, :]
    return d


def farthest_point_sample(xyz, n_point, key):
    # NOTE: the reference stores distances in an int64 tensor (truncation bug)
    # and picks a random start index; we keep float32 distances and a PRNG key.
    B, N, _ = xyz.shape
    farthest = jax.random.randint(key, (B,), 0, N, dtype=jnp.int32)
    distance = jnp.full((B, N), 1e10, dtype=jnp.float32)
    sample_idx = jnp.zeros((B, n_point), dtype=jnp.int32)

    def body(i, carry):
        s_idx, dist_acc, far = carry
        s_idx = s_idx.at[:, i].set(far)
        sample = jnp.take_along_axis(xyz, far[:, None, None], axis=1)  # [B,1,3]
        d = jnp.sum((xyz - sample) ** 2, axis=-1)                      # [B,N]
        dist_acc = jnp.minimum(dist_acc, d)
        far = jnp.argmax(dist_acc, axis=-1).astype(jnp.int32)
        return s_idx, dist_acc, far

    sample_idx, _, _ = lax.fori_loop(0, n_point, body,
                                     (sample_idx, distance, farthest))
    return sample_idx


def index_points(points, idx):
    # points [B,N,C], idx [B,...] -> [B, ..., C]
    B = points.shape[0]
    C = points.shape[-1]
    flat = idx.reshape(B, -1)
    g = jnp.take_along_axis(points, flat[..., None], axis=1)
    return g.reshape(idx.shape + (C,))


def radius_nn_sample(xyz, query, radius, k):
    B, N, _ = xyz.shape
    M = query.shape[1]
    d = compute_dist_square(xyz, query)                 # [B,N,M]
    d = jnp.transpose(d, (0, 2, 1))                     # [B,M,N]
    nn_idx = jnp.broadcast_to(jnp.arange(N, dtype=jnp.int32), (B, M, N))
    nn_idx = jnp.where(d > radius ** 2, N, nn_idx)
    nn_idx = jnp.sort(nn_idx, axis=-1)[:, :, :k]
    nearest = nn_idx[:, :, :1]
    nn_idx = jnp.where(nn_idx == N, nearest, nn_idx)
    return nn_idx


def sample_and_group(xyz, feat, n_point, radius, nn_k, key):
    # xyz [B,N,3], feat [B,N,D] or None
    sample_idx = farthest_point_sample(xyz, n_point, key)
    sample_points = index_points(xyz, sample_idx)                 # [B,M,3]
    nn_idx = radius_nn_sample(xyz, sample_points, radius, nn_k)   # [B,M,K]
    group_xyz = index_points(xyz, nn_idx)                         # [B,M,K,3]
    group_xyz_norm = group_xyz - sample_points[:, :, None, :]
    if feat is not None:
        group_feat = index_points(feat, nn_idx)
        group_points = jnp.concatenate([group_xyz_norm, group_feat], axis=-1)
    else:
        group_points = group_xyz_norm
    return sample_points, group_points


def sample_and_group_all(xyz, feat):
    B, N, C = xyz.shape
    sample_points = jnp.zeros((B, 1, C), xyz.dtype)
    group_xyz = xyz[:, None, :, :]
    if feat is not None:
        group_points = jnp.concatenate([group_xyz, feat[:, None, :, :]], axis=-1)
    else:
        group_points = group_xyz
    return sample_points, group_points


# ----------------------------- Pallas kernel ----------------------------- #

def _round_up(x, m):
    return ((x + m - 1) // m) * m


def _physical_vmem_bytes():
    try:
        info = pltpu.get_tpu_info()
        for attr in ("vmem_capacity_bytes", "vmem_bytes", "vmem_size_bytes"):
            v = getattr(info, attr, None)
            if v:
                return int(v)
    except Exception:
        pass
    return 64 * 1024 * 1024   # conservative default (v7x per-TC VMEM)


def _make_mlp_max_kernel(n_layers, tile_t, nn_k, k_chunk):
    n_chunks = nn_k // k_chunk

    def kernel(x_ref, *rest):
        o_ref = rest[-1]
        params = rest[:-1]
        x = x_ref[...]                                       # (T, K, Cin) bf16
        cin = x.shape[-1]
        hf = x.reshape(tile_t * nn_k, cin)

        # hidden layers: flattened 2-D matmul, bf16 operands, f32 accumulation
        for layer in range(n_layers - 1):
            w = params[2 * layer][...]                       # (C_l, C_{l+1}) bf16
            b = params[2 * layer + 1][...]                   # (1, C_{l+1}) f32
            z = jnp.dot(hf, w, preferred_element_type=jnp.float32)
            hf = jnp.maximum(z + b, 0.0).astype(jnp.bfloat16)

        # last layer: K-chunked matmul with a running (T, Cout) max so the
        # full (T, K, Cout) f32 intermediate never materializes.
        w_last = params[2 * (n_layers - 1)][...]
        b_last = params[2 * (n_layers - 1) + 1][...]
        c_prev = hf.shape[-1]
        c_out = w_last.shape[-1]
        h3 = hf.reshape(tile_t, nn_k, c_prev)
        acc = jnp.full((tile_t, c_out), -jnp.inf, dtype=jnp.float32)
        for c in range(n_chunks):
            chunk = h3[:, c * k_chunk:(c + 1) * k_chunk, :]
            chunk = chunk.reshape(tile_t * k_chunk, c_prev)
            z = jnp.dot(chunk, w_last, preferred_element_type=jnp.float32)
            z = jnp.maximum(z + b_last, 0.0)
            acc = jnp.maximum(acc, jnp.max(z.reshape(tile_t, k_chunk, c_out),
                                           axis=1))
        o_ref[...] = acc                                     # (T, Cout_pad) f32

    return kernel


def pointnet_mlp_max(group_points, kernel_ws, kernel_bs, c_last):
    """group_points: [B, M, K, Cin] -> [B, M, c_last] (float32)."""
    B, M, K, Cin = group_points.shape
    G = B * M
    c_pads = [w.shape[1] for w in kernel_ws]
    c_out_pad = c_pads[-1]
    max_c = max(c_pads)
    n_layers = len(kernel_ws)

    # bf16 in HBM: half the DMA bytes, native MXU operand dtype.
    x = group_points.reshape(G, K, Cin).astype(jnp.bfloat16)

    phys_vmem = _physical_vmem_bytes()
    vmem_limit = int(phys_vmem * 0.7)
    buf_budget = int(phys_vmem * 0.45)

    w_bytes = (sum(int(np.prod(w.shape)) * 2 for w in kernel_ws)
               + sum(int(np.prod(b.shape)) * 4 for b in kernel_bs))

    def tile_bytes(t):
        inp = 2 * t * K * Cin * 2            # double-buffered bf16 input blocks
        outp = 2 * t * c_out_pad * 4         # double-buffered f32 output blocks
        inter = 2 * t * K * max_c * 4        # ~two live per-layer intermediates
        return inp + outp + inter + w_bytes

    # Target ~2048 rows (T*K) per layer matmul so each grid step amortizes the
    # per-step overhead and fills the MXU; T is a multiple of 8.
    T = max(8, ((2048 // max(K, 1)) // 8) * 8)
    G8 = _round_up(G, 8)
    T = min(T, G8)
    if T >= G8 and G8 >= 16:
        T = max(8, ((G8 // 2) // 8) * 8)     # keep grid >= 2 (v7x has 2 TCs)
    while T > 8 and tile_bytes(T) > buf_budget:
        T -= 8

    G_pad = _round_up(G, T)
    if G_pad > G:
        x = jnp.pad(x, ((0, G_pad - G), (0, 0), (0, 0)))

    # Chunk the last layer over K so its f32 output stays small (<= 4 MiB).
    kc = K
    while kc > 1 and (T * kc * c_out_pad * 4 > (4 << 20) or K % kc != 0):
        kc -= 1

    in_specs = [pl.BlockSpec((T, K, Cin), lambda i: (i, 0, 0))]
    operands = [x]
    for w, b in zip(kernel_ws, kernel_bs):
        in_specs.append(pl.BlockSpec(w.shape, lambda i: (0, 0)))
        in_specs.append(pl.BlockSpec(b.shape, lambda i: (0, 0)))
        operands.append(w)
        operands.append(b)

    out = pl.pallas_call(
        _make_mlp_max_kernel(n_layers, T, K, kc),
        out_shape=jax.ShapeDtypeStruct((G_pad, c_out_pad), jnp.float32),
        grid=(G_pad // T,),
        in_specs=in_specs,
        out_specs=pl.BlockSpec((T, c_out_pad), lambda i: (i, 0)),
        compiler_params=pltpu.CompilerParams(
            dimension_semantics=("parallel",),
            vmem_limit_bytes=vmem_limit),
    )(*operands)

    return out[:G, :c_last].reshape(B, M, c_last)


# --------------------------- Module equivalent --------------------------- #

class PointNetSetAbstractionPallas:
    def __init__(self, n_points, radius, nn_k, in_channel, mlp,
                 group_all=False, key=jax.random.PRNGKey(42)):
        self.n_point = n_points
        self.radius = radius
        self.nn_k = nn_k
        self.group_all = group_all

        self.folded_ws = []       # f32, unpadded (for the pure-JAX reference)
        self.folded_bs = []
        self.kernel_ws = []       # bf16, channel-padded to multiples of 128
        self.kernel_bs = []       # f32,  channel-padded to multiples of 128

        last_channel = in_channel
        prev_pad = in_channel     # first layer's kernel input width (unpadded)
        eps = 1e-5
        for out_channel in mlp:
            key, kw, kb, kg, kbe, km, kv = jax.random.split(key, 7)
            # Conv2d(last_channel, out_channel, 1): weight (Cout, Cin), bias (Cout,)
            w = jax.random.normal(kw, (out_channel, last_channel), jnp.float32) * 0.2
            b = jax.random.normal(kb, (out_channel,), jnp.float32) * 0.05
            # BatchNorm2d params (inference-mode affine; deterministic init)
            gamma = 1.0 + 0.1 * jax.random.normal(kg, (out_channel,), jnp.float32)
            beta = 0.05 * jax.random.normal(kbe, (out_channel,), jnp.float32)
            run_mean = 0.05 * jax.random.normal(km, (out_channel,), jnp.float32)
            run_var = 1.0 + 0.1 * jax.random.uniform(kv, (out_channel,), jnp.float32)
            # TODO(synk): training-mode BatchNorm (batch statistics) not computed;
            # BN is folded as inference-mode affine into the conv weights/bias.
            scale = gamma / jnp.sqrt(run_var + eps)
            wf = (w * scale[:, None]).T                      # (Cin, Cout) f32
            bf = ((b - run_mean) * scale + beta)[None, :]    # (1, Cout) f32
            self.folded_ws.append(wf)
            self.folded_bs.append(bf)

            # lane-dense (128-padded) kernel params; zero padding is exact
            # (padded channels stay 0 through matmul + bias + ReLU).
            c_pad = _round_up(out_channel, 128)
            w_pad = jnp.zeros((prev_pad, c_pad), jnp.bfloat16)
            w_pad = w_pad.at[:last_channel, :out_channel].set(
                wf.astype(jnp.bfloat16))
            b_pad = jnp.zeros((1, c_pad), jnp.float32)
            b_pad = b_pad.at[:, :out_channel].set(bf)
            self.kernel_ws.append(w_pad)
            self.kernel_bs.append(b_pad)

            last_channel = out_channel
            prev_pad = c_pad
        self.c_last = last_channel

    def __call__(self, points_xyz, points_features, fps_key):
        # points_xyz [B, 3, N], points_features [B, D, N] (or None)
        xyz = jnp.transpose(points_xyz, (0, 2, 1))
        feat = (jnp.transpose(points_features, (0, 2, 1))
                if points_features is not None else None)
        if not self.group_all:
            out_xyz, group_points = sample_and_group(
                xyz, feat, self.n_point, self.radius, self.nn_k, fps_key)
        else:
            out_xyz, group_points = sample_and_group_all(xyz, feat)
        # group_points: [B, M, K, Cin]   (PyTorch works on [B, Cin, K, M])
        feats = pointnet_mlp_max(group_points, self.kernel_ws,
                                 self.kernel_bs, self.c_last)
        out_xyz = jnp.transpose(out_xyz, (0, 2, 1))          # [B, 3, M]
        out_features = jnp.transpose(feats, (0, 2, 1))       # [B, Cout, M]
        return out_xyz, out_features

    # pure-JAX reference of the kernel stage (same bf16/f32 mixed precision)
    def reference_mlp_max(self, group_points):
        h = group_points.astype(jnp.bfloat16)
        n = len(self.folded_ws)
        for l, (w, b) in enumerate(zip(self.folded_ws, self.folded_bs)):
            z = jnp.einsum("bmkc,cd->bmkd", h, w.astype(jnp.bfloat16),
                           preferred_element_type=jnp.float32)
            z = jnp.maximum(z + b[None, None], 0.0)
            h = z.astype(jnp.bfloat16) if l < n - 1 else z
        return jnp.max(h, axis=2)                            # [B, M, Cout] f32


# --------------------------------- main ---------------------------------- #

if __name__ == "__main__":
    B, N, D = 2, 16, 4
    n_points, nn_k, radius = 8, 8, 0.8
    mlp = [16, 32]
    in_channel = 3 + D

    key = jax.random.PRNGKey(0)
    k_xyz, k_feat, k_fps = jax.random.split(key, 3)
    points_xyz = jax.random.normal(k_xyz, (B, 3, N), jnp.float32)
    points_features = jax.random.normal(k_feat, (B, D, N), jnp.float32)

    module = PointNetSetAbstractionPallas(
        n_points, radius, nn_k, in_channel, mlp,
        group_all=False, key=jax.random.PRNGKey(42))

    out_xyz, out_features = module(points_xyz, points_features, k_fps)
    out_xyz = jax.block_until_ready(out_xyz)
    out_features = jax.block_until_ready(out_features)

    assert out_xyz.shape == (B, 3, n_points)
    assert out_features.shape == (B, mlp[-1], n_points)

    # verify the Pallas hot path against a pure-JAX reference
    xyz_t = jnp.transpose(points_xyz, (0, 2, 1))
    feat_t = jnp.transpose(points_features, (0, 2, 1))
    _, group_points = sample_and_group(xyz_t, feat_t, n_points, radius, nn_k, k_fps)
    ref = jnp.transpose(module.reference_mlp_max(group_points), (0, 2, 1))
    np.testing.assert_allclose(np.asarray(out_features), np.asarray(ref),
                               rtol=2e-3, atol=2e-3)

    print("KERNEL_OK")
</pallas_src>

<mosaic_0001>
module attributes {stable_mosaic.version = 11 : i64} {
  func.func @kernel(%arg0: i32, %arg1: memref<8x8x7xbf16, #tpu.memory_space<vmem>>, %arg2: memref<7x128xbf16, #tpu.memory_space<vmem>>, %arg3: memref<1x128xf32, #tpu.memory_space<vmem>>, %arg4: memref<128x128xbf16, #tpu.memory_space<vmem>>, %arg5: memref<1x128xf32, #tpu.memory_space<vmem>>, %arg6: memref<8x128xf32, #tpu.memory_space<vmem>>) attributes {dimension_semantics = [#tpu.dimension_semantics<parallel>], iteration_bounds = array<i64: 2>, scalar_prefetch = 0 : i64, scratch_operands = 0 : i64, tpu.core_type = #tpu.core_type<tc>, window_params = [{transform_indices = @transform_0, window_bounds = array<i64: 8, 8, 7>}, {pipeline_mode = #tpu.pipeline_mode<synchronous>, transform_indices = @transform_1, window_bounds = array<i64: 7, 128>}, {pipeline_mode = #tpu.pipeline_mode<synchronous>, transform_indices = @transform_2, window_bounds = array<i64: 1, 128>}, {pipeline_mode = #tpu.pipeline_mode<synchronous>, transform_indices = @transform_3, window_bounds = array<i64: 128, 128>}, {pipeline_mode = #tpu.pipeline_mode<synchronous>, transform_indices = @transform_4, window_bounds = array<i64: 1, 128>}, {transform_indices = @transform_5, window_bounds = array<i64: 8, 128>}]} {
    %c0 = arith.constant 0 : index
    %c0_0 = arith.constant 0 : index
    %c0_1 = arith.constant 0 : index
    %0 = vector.load %arg1[%c0, %c0_0, %c0_1] : memref<8x8x7xbf16, #tpu.memory_space<vmem>>, vector<8x8x7xbf16>
    %1 = vector.shape_cast %0 : vector<8x8x7xbf16> to vector<64x7xbf16>
    %c0_2 = arith.constant 0 : index
    %c0_3 = arith.constant 0 : index
    %2 = vector.load %arg2[%c0_2, %c0_3] : memref<7x128xbf16, #tpu.memory_space<vmem>>, vector<7x128xbf16>
    %c0_4 = arith.constant 0 : index
    %c0_5 = arith.constant 0 : index
    %3 = vector.load %arg3[%c0_4, %c0_5] : memref<1x128xf32, #tpu.memory_space<vmem>>, vector<1x128xf32>
    %cst = arith.constant dense<0.000000e+00> : vector<64x128xf32>
    %4 = tpu.matmul %1, %2, %cst {dimension_numbers = #tpu.dot_dimension_numbers<[1], [0], [0], [1], [0, 0, 1, 1], [], []>} : vector<64x7xbf16>, vector<7x128xbf16>, vector<64x128xf32> -> vector<64x128xf32>
    %5 = vector.broadcast %3 : vector<1x128xf32> to vector<64x128xf32>
    %6 = arith.addf %4, %5 : vector<64x128xf32>
    %cst_6 = arith.constant 0.000000e+00 : f32
    %7 = vector.broadcast %cst_6 : f32 to vector<64x128xf32>
    %8 = arith.maximumf %6, %7 : vector<64x128xf32>
    %9 = arith.truncf %8 : vector<64x128xf32> to vector<64x128xbf16>
    %c0_7 = arith.constant 0 : index
    %c0_8 = arith.constant 0 : index
    %10 = vector.load %arg4[%c0_7, %c0_8] : memref<128x128xbf16, #tpu.memory_space<vmem>>, vector<128x128xbf16>
    %c0_9 = arith.constant 0 : index
    %c0_10 = arith.constant 0 : index
    %11 = vector.load %arg5[%c0_9, %c0_10] : memref<1x128xf32, #tpu.memory_space<vmem>>, vector<1x128xf32>
    %12 = vector.shape_cast %9 : vector<64x128xbf16> to vector<8x8x128xbf16>
    %cst_11 = arith.constant 0xFF800000 : f32
    %13 = vector.broadcast %cst_11 : f32 to vector<8x128xf32>
    %14 = vector.shape_cast %12 : vector<8x8x128xbf16> to vector<64x128xbf16>
    %cst_12 = arith.constant dense<0.000000e+00> : vector<64x128xf32>
    %15 = tpu.matmul %14, %10, %cst_12 {dimension_numbers = #tpu.dot_dimension_numbers<[1], [0], [0], [1], [0, 0, 1, 1], [], []>} : vector<64x128xbf16>, vector<128x128xbf16>, vector<64x128xf32> -> vector<64x128xf32>
    %16 = vector.broadcast %11 : vector<1x128xf32> to vector<64x128xf32>
    %17 = arith.addf %15, %16 : vector<64x128xf32>
    %cst_13 = arith.constant 0.000000e+00 : f32
    %18 = vector.broadcast %cst_13 : f32 to vector<64x128xf32>
    %19 = arith.maximumf %17, %18 : vector<64x128xf32>
    %20 = vector.shape_cast %19 : vector<64x128xf32> to vector<8x8x128xf32>
    %cst_14 = arith.constant dense<0xFF800000> : vector<8x128xf32>
    %21 = vector.multi_reduction <maximumf>, %20, %cst_14 [1] : vector<8x8x128xf32> to vector<8x128xf32>
    %22 = arith.maximumf %13, %21 : vector<8x128xf32>
    %c0_15 = arith.constant 0 : index
    %c0_16 = arith.constant 0 : index
    %23 = vector.load %arg6[%c0_15, %c0_16] : memref<8x128xf32, #tpu.memory_space<vmem>>, vector<8x128xf32>
    tpu.vector_store %arg6[%c0_15, %c0_16], %22 {strides = array<i32>} : memref<8x128xf32, #tpu.memory_space<vmem>>, vector<8x128xf32>,
    return
  }
  func.func @transform_0(%arg0: i32) -> (i32, i32, i32) {
    %c0_i32 = arith.constant 0 : i32
    %c0_i32_0 = arith.constant 0 : i32
    %c0_i32_1 = arith.constant 0 : i32
    return %arg0, %c0_i32, %c0_i32_0 : i32, i32, i32
  }
  func.func @transform_1(%arg0: i32) -> (i32, i32) {
    %c0_i32 = arith.constant 0 : i32
    %c0_i32_0 = arith.constant 0 : i32
    %c0_i32_1 = arith.constant 0 : i32
    return %c0_i32, %c0_i32_0 : i32, i32
  }
  func.func @transform_2(%arg0: i32) -> (i32, i32) {
    %c0_i32 = arith.constant 0 : i32
    %c0_i32_0 = arith.constant 0 : i32
    %c0_i32_1 = arith.constant 0 : i32
    return %c0_i32, %c0_i32_0 : i32, i32
  }
  func.func @transform_3(%arg0: i32) -> (i32, i32) {
    %c0_i32 = arith.constant 0 : i32
    %c0_i32_0 = arith.constant 0 : i32
    %c0_i32_1 = arith.constant 0 : i32
    return %c0_i32, %c0_i32_0 : i32, i32
  }
  func.func @transform_4(%arg0: i32) -> (i32, i32) {
    %c0_i32 = arith.constant 0 : i32
    %c0_i32_0 = arith.constant 0 : i32
    %c0_i32_1 = arith.constant 0 : i32
    return %c0_i32, %c0_i32_0 : i32, i32
  }
  func.func @transform_5(%arg0: i32) -> (i32, i32) {
    %c0_i32 = arith.constant 0 : i32
    %c0_i32_0 = arith.constant 0 : i32
    return %arg0, %c0_i32 : i32, i32
  }
}

</mosaic_0001>

<bundles_post_ra>
// kernel: tpu_custom_call.1
= control target key start
LH: loop header
LB: loop body
LE: loop exit
PB: predicated region body
PF: predicated region fallthrough
CT: control target
= control target key end

     0   :  { %10 = vsyncpa [#allocation3], 0  ;;  %s1033_s0 = inlined_call_operand.vmem [shape: bf16[16,8,7], index: 0, kind: input, shape index: {}]   ;;  %s1034_s1 = inlined_call_operand.vmem [shape: bf16[7,128], index: 1, kind: input, shape index: {}]   ;;  %s1035_s2 = inlined_call_operand.vmem [shape: f32[1,128], index: 2, kind: input, shape index: {}]   ;;  %s1036_s3 = inlined_call_operand.vmem [shape: bf16[128,128], index: 3, kind: input, shape index: {}]   ;;  %s1037_s4 = inlined_call_operand.vmem [shape: f32[1,128], index: 4, kind: input, shape index: {}]   ;;  %s1038_s5 = inlined_call_operand.hbm [shape: f32[16,128], index: 5, kind: output, shape index: {}]  }
   0x1   :  { %12 = vsyncpa [#allocation3 + $0x1], 0  ;;  %s892_s18 = smov 0   ;;  %s894_s19 = smov 0  }
   0x2   :  { %s896_s20 = smov 0   ;;  %s898_s21 = smov 0  }
   0x3 LB: > { %s913_s22 = sadd.s32 4294967295, %s858_s21   ;;  %s648_s23 = sadd.s32 4294967294, %s858_s21   ;;  %s858_s21 = sphi %s898_s21, %s1044_s21   ;;  %s854_s20 = sphi %s896_s20, %s1043_s20   ;;  %s850_s19 = sphi %s894_s19, %s1042_s19   ;;  %s846_s18 = sphi %s892_s18, %s1041_s18  }
   0x4   : > { %s917_s24 = sadd.s32 1, %s858_s21   ;;  %s135_s25 = sadd.s32 1, %s854_s20 }
   0x5   : > { %s132_s26 = ssub.s32 %s858_s21, %s917_s24  ;;  %p145_p0 = scmp.ne.s32.totalorder %s854_s20, %s850_s19 }
   0x6   : > { %p133_p1 = scmp.eq.s32.totalorder %s132_s26, 0  ;;  %p146_p2 = scmp.eq.s32.totalorder %s913_s22, 1 }
   0x7   : > { %p151_p3 = scmp.ne.s32.totalorder %s850_s19, %s846_s18  ;;  %p152_p4 = scmp.eq.s32.totalorder %s648_s23, 1 }
   0x8   : > { %s928_s27 = scalar_select %p133_p1, %s854_s20, %s135_s25  }
   0x9   : > { %p930_p5 = por %p146_p2, %p145_p0  ;;  %p934_p6 = por %p152_p4, %p151_p3 }
   0xa   : > { %p651_p7 = scmp.ge.s32.totalorder %s858_s21, 1  ;;  %p191_p8 = scmp.lt.s32.totalorder %s858_s21, 3 }
   0xc   : > { %p192_p9 = pnand %p651_p7, %p191_p8 }
   0xd   : > { %v234_v0 = vld [vmem:[%s1034_s1] sm:$0xf] (!%p192_p9)  ;;  %vm275_vm0 = vcmask (!%p192_p9), 1042432   ;;  %vm276_vm1 = vcmask (!%p192_p9), 1043456   ;;  %s653_s7 = sshll.u32 (!%p192_p9), %s913_s22, 3  ;;  %v860_v1 = vmov (!%p192_p9), 65535  }
   0xe   : > { %195 = sbr.rel (%p192_p9) target bundleno = 504 (0x1f8), region = 40  ;;  %v277_v2 = vsel (!%p192_p9), %vm275_vm0, 4294967295, %v860_v1  ;;  %p220_p10 = scmp.lt.s32.totalorder (!%p192_p9), %s653_s7, 15  ;;  %v788_v3 = vld [vmem:[%s1036_s3] sm:$0xff] (!%p192_p9)   ;;  %v789_v6 = vld [vmem:[%s1036_s3 + $0x8] sm:$0xff] (!%p192_p9)   ;;  %vm262_vm2 = vcmask (!%p192_p9), 56320  }
   0xf   : > { %v278_v4 = vsel (!%p192_p9), %vm276_vm1, %v277_v2, 0  ;;  %728 = vmatprep.subr.bf16.mxu1 (!%p192_p9), %v788_v3  ;;  %v790_v7 = vld [vmem:[%s1036_s3 + $0x10] sm:$0xff] (!%p192_p9)   ;;  %v791_v11 = vld [vmem:[%s1036_s3 + $0x18] sm:$0xff] (!%p192_p9)   ;;  %v792_v13 = vld [vmem:[%s1036_s3 + $0x20] sm:$0xff] (!%p192_p9)   ;;  %vm559_vm3 = vcmask (!%p192_p9), 1041409   ;;  %vm561_vm4 = vcmask (!%p192_p9), 1042434  }
  0x10   : > { %v280_v5 = vand.u32 (!%p192_p9), %v278_v4, %v234_v0  ;;  %736 = vmatpush3.bf16.msra.mxu1 (!%p192_p9), %v788_v3  ;;  %v793_v14 = vld [vmem:[%s1036_s3 + $0x28] sm:$0xff] (!%p192_p9)   ;;  %v794_v15 = vld [vmem:[%s1036_s3 + $0x30] sm:$0xff] (!%p192_p9)   ;;  %v795_v16 = vld [vmem:[%s1036_s3 + $0x38] sm:$0xff] (!%p192_p9)   ;;  %s216_s16 = sand.u32 (!%p192_p9), 1, %s850_s19   ;;  %vm563_vm5 = vcmask (!%p192_p9), 1043459   ;;  %vm565_vm6 = vcmask (!%p192_p9), 1044484  }
  0x11   : > { %729 = vmatprep.subr.bf16.mxu1 (!%p192_p9), %v789_v6  ;;  %v655_v17 = vld [vmem:[%s1035_s2] ss:$0 sm:$0xff] (!%p192_p9)  ;;  %s652_s17 = sshll.u32 (!%p192_p9), %s216_s16, 3  ;;  %vm567_vm7 = vcmask (!%p192_p9), 1045509   ;;  %vm569_vm8 = vcmask (!%p192_p9), 1046534   ;;  %s674_s23 = sshll.u32 (!%p192_p9), %s913_s22, 7 }
  0x12   : > { %694 = vmatprep.subr.bf16.mxu0 (!%p192_p9), %v280_v5  ;;  %v664_v46 = vld [vmem:[%s1037_s4] ss:$0 sm:$0xff] (!%p192_p9)  ;;  %s218_s25 = scalar_lea.vmem (!%p192_p9), [#allocation2], %s652_s17  ;;  %vm571_vm9 = vcmask (!%p192_p9), 1047559   ;;  %s576_s22 = scalar_lea.sflag (!%p192_p9), [#allocation3], %s216_s16 }
  0x13   : > { %695 = vmatpush3.bf16.msra.mxu0 (!%p192_p9), %v280_v5  ;;  %s589_s26 = sshll.u32 (!%p192_p9), %s218_s25, 4  ;;  %s861_s9 = smov (!%p192_p9), [#allocation2]   ;;  %s991_s26 = int_to_ptr.vmem [resolvable:$true] %s589_s26 }
  0x14   : > { %704 = vmatprep.subr.bf16.mxu0 (!%p192_p9), %v788_v3  ;;  %737 = vmatpush3.bf16.msra.mxu1 (!%p192_p9), %v789_v6  ;;  %s796_s8 = scalar_lea.vmem (!%p192_p9), %s991_s26, 128  ;;  %s800_s10 = sshll.u32 (!%p192_p9), %s861_s9, 4  ;;  %s801_s10 = int_to_ptr.vmem [resolvable:$false] %s800_s10 }
  0x15   : > { %s1046_s7 = smov (!%p220_p10, %s653_s7), 15  ;;  %730 = vmatprep.subr.bf16.mxu1 %v790_v7  ;;  %p797_p11 = scmp.ne.s32.totalorder %s991_s26, %s796_s8 }
  0x16   : > { %s654_s12 = sshll.u32 %s1046_s7, 2  ;;  %s989_s7 = scalar_lea.hbm %s1038_s5, %s674_s23 }
  0x17   : > { %s223_s15 = scalar_lea.vmem %s1033_s0, %s654_s12  ;;  %p798_p12 = pnand %p797_p11, %p930_p5 }
  0x18   : > { %v784_v8 = vld [vmem:[%s223_s15] sm:$0xff]   ;;  %v785_v9 = vld [vmem:[%s223_s15 + $0x8] sm:$0xff]   ;;  %v786_v10 = vld [vmem:[%s223_s15 + $0x10] sm:$0xff]   ;;  %738 = vmatpush3.bf16.msra.mxu1 %v790_v7  ;;  %s802_s11 = scalar_lea.vmem %s801_s10, 256  ;;  %p803_p0 = scmp.lt.s32.totalorder %s991_s26, %s801_s10 }
  0x19   : > { %696 = vmatprep.mubr.msk.bf16.mxu0 %vm262_vm2, %v784_v8  ;;  %731 = vmatprep.subr.bf16.mxu1 %v791_v11  ;;  %v787_v12 = vld [vmem:[%s223_s15 + $0x18] sm:$0xff]   ;;  %p799_p13 = pneg %p798_p12  ;;  %p804_p1 = scmp.lt.s32.totalorder %s802_s11, %s796_s8 }
  0x1a   : > { %697 = vmatmul.mubr.msk.bf16.vlgmr.msra.gmra.mrb[0].mxu0 %vm262_vm2, %v785_v9 }
  0x1b   : > { %700 = vmatprep.mubr.msk.bf16.mxu0 %vm262_vm2, %v786_v10  ;;  %705 = vmatpush3.bf16.msra.mxu0 %v788_v3  ;;  %p805_p2 = por %p804_p1, %p803_p0 }
  0x1c   : > { %706 = vmatprep.subr.bf16.mxu0 %v789_v6  ;;  %739 = vmatpush3.bf16.msra.mxu1 %v791_v11 }
  0x1d   : > { %732 = vmatprep.subr.bf16.mxu1 %v792_v13  ;;  %p806_p3 = pnand %p805_p2, %p799_p13 }
  0x1f   : > { %707 = vmatpush3.bf16.msra.mxu0 %v789_v6 }
  0x20   : > { %708 = vmatprep.subr.bf16.mxu0 %v790_v7  ;;  %740 = vmatpush3.bf16.msra.mxu1 %v792_v13 }
  0x21   : > { %733 = vmatprep.subr.bf16.mxu1 %v793_v14 }
  0x22   : > { %701 = vmatmul.mubr.msk.bf16.gmra.mrb[4].mxu0 %vm262_vm2, %v787_v12 }
  0x23   : > { %709 = vmatpush3.bf16.msra.mxu0 %v790_v7 }
  0x24   : > { %710 = vmatprep.subr.bf16.mxu0 %v791_v11  ;;  %741 = vmatpush3.bf16.msra.mxu1 %v793_v14 }
  0x25   : > { %734 = vmatprep.subr.bf16.mxu1 %v794_v15 }
  0x27   : > { %711 = vmatpush3.bf16.msra.mxu0 %v791_v11 }
  0x28   : > { %712 = vmatprep.subr.bf16.mxu0 %v792_v13  ;;  %742 = vmatpush3.bf16.msra.mxu1 %v794_v15 }
  0x29   : > { %735 = vmatprep.subr.bf16.mxu1 %v795_v16 }
  0x2b   : > { %713 = vmatpush3.bf16.msra.mxu0 %v792_v13 }
  0x2c   : > { %714 = vmatprep.subr.bf16.mxu0 %v793_v14  ;;  %743 = vmatpush3.bf16.msra.mxu1 %v795_v16 }
  0x2f   : > { %715 = vmatpush3.bf16.msra.mxu0 %v793_v14 }
  0x30   : > { %716 = vmatprep.subr.bf16.mxu0 %v794_v15 }
  0x33   : > { %717 = vmatpush3.bf16.msra.mxu0 %v794_v15 }
  0x34   : > { %718 = vmatprep.subr.bf16.mxu0 %v795_v16 }
  0x37   : > { %719 = vmatpush3.bf16.msra.mxu0 %v795_v16 }
  0xed   : > { %v698_v18 = vpop.f32.mrb[0].mxu0 }
  0xee   : > { %v325_v19 = vadd.f32 %v698_v18, %v655_v17  ;;  %v316_v20 = vpop.f32.mrb[1].mxu0 }
  0xef   : > { %v317_v21 = vadd.f32 %v655_v17, %v316_v20  ;;  %v699_v22 = vpop.f32.mrb[2].mxu0 }
  0xf0   : > { %v328_v23 = vadd.f32 %v699_v22, %v655_v17  ;;  %v319_v24 = vpop.f32.mrb[3].mxu0  ;;  %v349_v26 = vmax.f32 %v325_v19, 0.0 }
  0xf1   : > { %v320_v25 = vadd.f32 %v655_v17, %v319_v24  ;;  %v347_v28 = vmax.f32 %v317_v21, 0.0 }
  0xf2   : > { %v350_v27 = vmax.f32 %v328_v23, 0.0 }
  0xf3   : > { %v348_v29 = vmax.f32 %v320_v25, 0.0 }
  0xf4   : > { %v356_v30 = vpack.c.bf16 %v350_v27, %v349_v26 }
  0xf5   : > { %v355_v31 = vpack.c.bf16 %v348_v29, %v347_v28  ;;  %v702_v32 = vpop.f32.mrb[4].mxu0 }
  0xf6   : > { %v341_v33 = vadd.f32 %v702_v32, %v655_v17  ;;  %v332_v34 = vpop.f32.mrb[5].mxu0 }
  0xf7   : > { %v333_v35 = vadd.f32 %v655_v17, %v332_v34  ;;  %v703_v36 = vpop.f32.mrb[6].mxu0  ;;  %720 = vmatprep.mubr.bf16.mxu0 %v355_v31 }
  0xf8   : > { %v344_v37 = vadd.f32 %v703_v36, %v655_v17  ;;  %v335_v38 = vpop.f32.mrb[7].mxu0  ;;  %721 = vmatmul.mubr.bf16.vlgmr.msra.gmra.mrb[8].mxu0 %v356_v30  ;;  %v353_v40 = vmax.f32 %v341_v33, 0.0 }
  0xf9   : > { %v336_v39 = vadd.f32 %v655_v17, %v335_v38  ;;  %v351_v42 = vmax.f32 %v333_v35, 0.0 }
  0xfa   : > { %v354_v41 = vmax.f32 %v344_v37, 0.0 }
  0xfb   : > { %v352_v43 = vmax.f32 %v336_v39, 0.0 }
  0xfc   : > { %v358_v44 = vpack.c.bf16 %v354_v41, %v353_v40 }
  0xfd   : > { %v357_v45 = vpack.c.bf16 %v352_v43, %v351_v42 }
  0xff   : > { %724 = vmatprep.mubr.bf16.mxu1 %v357_v45 }
 0x100   : > { %725 = vmatmul.mubr.bf16.vlgmr.msra.gmra.mrb[0].mxu1 %v358_v44 }
 0x1cb   : > { %v722_v47 = vpop.f32.mrb[8].mxu0 }
 0x1cc   : > { %v473_v48 = vadd.f32 %v722_v47, %v664_v46  ;;  %v464_v49 = vpop.f32.mrb[9].mxu0 }
 0x1cd   : > { %v465_v50 = vadd.f32 %v664_v46, %v464_v49  ;;  %v723_v51 = vpop.f32.mrb[10].mxu0 }
 0x1ce   : > { %v497_v52 = vmax.f32 %v473_v48, 0.0  ;;  %v476_v53 = vadd.f32 %v723_v51, %v664_v46  ;;  %v467_v54 = vpop.f32.mrb[11].mxu0 }
 0x1cf   : > { %v495_v55 = vmax.f32 %v465_v50, 0.0  ;;  %v468_v56 = vadd.f32 %v664_v46, %v467_v54 }
 0x1d0   : > { %v515_v57 = vrot.slane %v497_v52, 4  ;;  %v498_v58 = vmax.f32 %v476_v53, 0.0 }
 0x1d1   : > { %v503_v59 = vrot.slane %v495_v55, 4  ;;  %v496_v60 = vmax.f32 %v468_v56, 0.0 }
 0x1d2   : > { %v516_v61 = vmax.f32 %v497_v52, %v515_v57  ;;  %v521_v62 = vrot.slane %v498_v58, 4 }
 0x1d3   : > { %v504_v63 = vmax.f32 %v495_v55, %v503_v59  ;;  %v509_v0 = vrot.slane %v496_v60, 4  ;;  %v726_v1 = vpop.f32.mrb[0].mxu1 }
 0x1d4   : > { %v517_v2 = vrot.slane %v516_v61, 2  ;;  %v522_v3 = vmax.f32 %v498_v58, %v521_v62  ;;  %v489_v4 = vadd.f32 %v726_v1, %v664_v46  ;;  %v480_v5 = vpop.f32.mrb[1].mxu1 }
 0x1d5   : > { %v505_v6 = vrot.slane %v504_v63, 2  ;;  %v510_v7 = vmax.f32 %v496_v60, %v509_v0  ;;  %v481_v8 = vadd.f32 %v664_v46, %v480_v5  ;;  %v727_v9 = vpop.f32.mrb[2].mxu1 }
 0x1d6   : > { %v518_v10 = vmax.f32 %v516_v61, %v517_v2  ;;  %v523_v11 = vrot.slane %v522_v3, 2  ;;  %v501_v12 = vmax.f32 %v489_v4, 0.0  ;;  %v492_v13 = vadd.f32 %v727_v9, %v664_v46  ;;  %v483_v14 = vpop.f32.mrb[3].mxu1 }
 0x1d7   : > { %v506_v15 = vmax.f32 %v504_v63, %v505_v6  ;;  %v511_v16 = vrot.slane %v510_v7, 2  ;;  %v499_v17 = vmax.f32 %v481_v8, 0.0  ;;  %v484_v18 = vadd.f32 %v664_v46, %v483_v14 }
 0x1d8   : > { %v524_v19 = vmax.f32 %v522_v3, %v523_v11  ;;  %v539_v20 = vrot.slane %v501_v12, 4  ;;  %v502_v21 = vmax.f32 %v492_v13, 0.0  ;;  %v519_v26 = vrot.slane %v518_v10, 1 }
 0x1d9   : > { %v507_v22 = vrot.slane %v506_v15, 1  ;;  %v512_v23 = vmax.f32 %v510_v7, %v511_v16  ;;  %v527_v24 = vrot.slane %v499_v17, 4  ;;  %v500_v25 = vmax.f32 %v484_v18, 0.0 }
 0x1da   : > { %v540_v27 = vmax.f32 %v501_v12, %v539_v20  ;;  %v545_v28 = vrot.slane %v502_v21, 4  ;;  %v525_v29 = vrot.slane %v524_v19, 1  ;;  %v520_v39 = vmax.f32 %v518_v10, %v519_v26 }
 0x1db   : > { %v513_v30 = vrot.slane %v512_v23, 1  ;;  %v528_v31 = vmax.f32 %v499_v17, %v527_v24  ;;  %v533_v32 = vrot.slane %v500_v25, 4  ;;  %v508_v35 = vmax.f32 %v506_v15, %v507_v22 }
 0x1dc   : > { %v541_v33 = vrot.slane %v540_v27, 2  ;;  %v546_v34 = vmax.f32 %v502_v21, %v545_v28  ;;  %v526_v42 = vmax.f32 %v524_v19, %v525_v29 }
 0x1dd   : > { %v514_v36 = vmax.f32 %v512_v23, %v513_v30  ;;  %v529_v37 = vrot.slane %v528_v31, 2  ;;  %v534_v38 = vmax.f32 %v500_v25, %v533_v32 }
 0x1de   : > { %v542_v40 = vmax.f32 %v540_v27, %v541_v33  ;;  %v547_v41 = vrot.slane %v546_v34, 2 }
 0x1df   : > { %v560_v43 = vsel %vm559_vm3, %v514_v36, %v508_v35  ;;  %v530_v44 = vmax.f32 %v528_v31, %v529_v37  ;;  %v535_v45 = vrot.slane %v534_v38, 2 }
 0x1e0   : > { %v562_v46 = vsel %vm561_vm4, %v520_v39, %v560_v43  ;;  %v548_v47 = vmax.f32 %v546_v34, %v547_v41  ;;  %v543_v51 = vrot.slane %v542_v40, 1 }
 0x1e1   : > { %v531_v48 = vrot.slane %v530_v44, 1  ;;  %v536_v49 = vmax.f32 %v534_v38, %v535_v45  ;;  %v564_v50 = vsel %vm563_vm5, %v526_v42, %v562_v46 }
 0x1e2   : > { %v549_v53 = vrot.slane %v548_v47, 1  ;;  %v544_v57 = vmax.f32 %v542_v40, %v543_v51 }
 0x1e3   : > { %v532_v52 = vmax.f32 %v530_v44, %v531_v48  ;;  %v537_v54 = vrot.slane %v536_v49, 1 }
 0x1e4   : > { %v550_v58 = vmax.f32 %v548_v47, %v549_v53 }
 0x1e5   : > { %v538_v55 = vmax.f32 %v536_v49, %v537_v54  ;;  %v566_v56 = vsel %vm565_vm6, %v532_v52, %v564_v50 }
 0x1e7   : > { %v568_v59 = vsel %vm567_vm7, %v538_v55, %v566_v56 }
 0x1e8   : > { %v570_v60 = vsel %vm569_vm8, %v544_v57, %v568_v59 }
 0x1e9   : > { %v572_v61 = vsel %vm571_vm9, %v550_v58, %v570_v60 }
 0x1ea   : > { %574 = vst [vmem:[%s218_s25] sm:$0xff] %v572_v61 }
 0x1eb   : > { %809 = shalt.err (!%p806_p3)
}
 0x1ec   : > { %s810_s12 = scalar_lea.hbm %s989_s7, 128  ;;  %s814_s15 = scalar_lea.hbm %s1038_s5, 256 }
 0x1ed   : > { %p811_p4 = scmp.ne.s32.totalorder %s989_s7, %s810_s12  ;;  %p815_p9 = scmp.lt.u32.totalorder %s989_s7, %s1038_s5 }
 0x1ee   : > { %p816_p10 = scmp.lt.u32.totalorder %s814_s15, %s810_s12  ;;  %p818_p12 = scmp.lt.u32.totalorder %s810_s12, %s989_s7 }
 0x1ef   : > { %p812_p7 = pnand %p811_p4, %p930_p5 }
 0x1f0   : > { %p817_p11 = por %p816_p10, %p815_p9 }
 0x1f1   : > { %p813_p8 = pneg %p812_p7 }
 0x1f2   : > { %p819_p13 = por %p818_p12, %p817_p11 }
 0x1f4   : > { %p820_p0 = pnand %p819_p13, %p813_p8 }
 0x1f6   : > { %823 = shalt.err (!%p820_p0)
}
 0x1f7   : > { %744 = dma.vmem_to_hbm [thread:$0]  (%p930_p5), %s991_s26, 128, %s989_s7, %s576_s22  }
 0x1f8 PF: > { %p750_p1 = scmp.ge.s32.totalorder %s858_s21, 2  ;;  %s601_s23 = sand.u32 1, %s846_s18  }
 0x1f9   : > { %s602_s25 = scalar_lea.sflag [#allocation3], %s601_s23 }
 0x1fa   : > { %p747_p2 = pnand %p750_p1, %p934_p6 }
 0x1fc   : > { %841 = dma.done.wait (!%p747_p2), %s602_s25, 128  }
 0x1fd   : > { %843 = vsyncadd (!%p747_p2), %s602_s25, 4294967168  ;;  %p15_p3 = scmp.ge.s32.totalorder %s917_s24, 4   ;;  %s1041_s18 = smov %s850_s19 }
 0x1fe   : > { %s1042_s19 = smov %s854_s20  ;;  %s1043_s20 = smov %s928_s27 }
 0x1ff   : > { %s1044_s21 = smov %s917_s24  ;;  %17 = sbr.rel (!%p15_p3) target bundleno = 3 (0x3), region = 75 }
 0x206   :  { %607 = vsyncpa [#allocation3], 1 }
 0x207   :  { %609 = vsyncpa [#allocation3 + $0x1], 1 }

</bundles_post_ra>
